<compile_context>
chip_gen: v6e
topology: v6e:2x2x1
jax: 0.10.0
libtpu: 0.0.40
codegen_flags: <defaults>
</compile_context>

<pallas_src>
import functools

import jax
import jax.numpy as jnp
from jax.experimental import pallas as pl
from jax.experimental.pallas import tpu as pltpu

LANE = 128
SUBLANE = 8

# Per-input block byte budget: 2 inputs x 2 pipeline buffers x 4 MiB = 16 MiB
# of VMEM for the input pipeline, comfortably inside the scoped limit below
# (v5e scoped default is only 16 MiB; v7x physical VMEM is 64 MiB).
_DEFAULT_BLOCK_BUDGET = 4 * 1024 * 1024
_VMEM_LIMIT_BYTES = 32 * 1024 * 1024


def _dice_partial_kernel(x_ref, t_ref, oi_ref, os_ref, *,
                         sig, blk1, limit, n_k, needs_mask):
    """Accumulate per-sample dice partials.

    Aligned path: x_ref/t_ref are (TB, TR, 128) tiles, outputs (TB, 1, 128).
    Ragged  path: x_ref/t_ref are (TB, TC)      tiles, outputs (TB, 1).
    Outputs are resident across the reduction (k) grid axis and accumulated
    in place; the cross-lane reduce + dice formula happen in the wrapper.
    """
    k = pl.program_id(1)

    @pl.when(k == 0)
    def _init():
        oi_ref[...] = jnp.zeros_like(oi_ref)
        os_ref[...] = jnp.zeros_like(os_ref)

    x = x_ref[...].astype(jnp.float32)
    t = t_ref[...].astype(jnp.float32)

    if sig:
        # Exact sigmoid via a single EUP tanh push (cheaper than exp + recip,
        # and matches jax.nn.sigmoid, unlike the approx-reciprocal form).
        x = 0.5 * (jnp.tanh(0.5 * x) + 1.0)

    def _accum(xv, tv):
        oi_ref[...] += jnp.sum(xv * tv, axis=1, keepdims=True)   # intersection
        os_ref[...] += jnp.sum(xv + tv, axis=1, keepdims=True)   # sum(x)+sum(t)

    if needs_mask:
        # Out-of-range / garbage elements can only appear in the LAST block of
        # the reduction axis, so the iota/compare/select work is gated there.
        last = n_k - 1

        @pl.when(k != last)
        def _full():
            _accum(x, t)

        @pl.when(k == last)
        def _edge():
            pos = k * blk1 + jax.lax.broadcasted_iota(jnp.int32, x.shape, 1)
            valid = pos < limit
            _accum(jnp.where(valid, x, 0.0), jnp.where(valid, t, 0.0))
    else:
        _accum(x, t)


def _largest_divisor_leq(n, cap):
    cap = max(1, min(n, cap))
    for d in range(cap, 0, -1):
        if n % d == 0:
            return d
    return 1


def _round_up(x, m):
    return ((x + m - 1) // m) * m


@functools.partial(jax.jit, static_argnames=("sig", "block_budget_bytes"))
def dice_loss_batch(inputs_, targets, smooth=1.0, sig=False,
                    block_budget_bytes=_DEFAULT_BLOCK_BUDGET):
    """JAX/Pallas equivalent of DiceLoss_batch.forward (per-sample dice, batch mean)."""
    if inputs_.shape != targets.shape:
        raise ValueError("inputs_ and targets must have the same shape")
    B = inputs_.shape[0]
    x = inputs_.reshape(B, -1)    # layout-preserving, no HBM copy under jit
    t = targets.reshape(B, -1)
    N = x.shape[1]
    if N >= 2 ** 31:
        raise ValueError("per-sample element count must fit in int32 index math")

    if N < LANE:
        # TODO(synk): samples smaller than one 128-lane vector are not worth a
        # kernel launch; compute directly in XLA.
        xs = x.astype(jnp.float32)
        ts = t.astype(jnp.float32)
        if sig:
            xs = jax.nn.sigmoid(xs)
        inter = jnp.sum(xs * ts, axis=1)
        total = jnp.sum(xs, axis=1) + jnp.sum(ts, axis=1)
        return jnp.mean(1.0 - (2.0 * inter + smooth) / (total + smooth))

    itemsize = max(jnp.dtype(x.dtype).itemsize, jnp.dtype(t.dtype).itemsize)

    if N % LANE == 0:
        # ---- aligned path: free reshape to (B, R, 128) -> full (sublane, lane)
        # vreg utilization; per-sample lane partials accumulated in (TB,1,128).
        R = N // LANE
        xk = x.reshape(B, R, LANE)
        tk = t.reshape(B, R, LANE)

        rows_budget = max(SUBLANE, block_budget_bytes // (LANE * itemsize))
        # Pack whole small samples per step, but keep >= 2 steps on the
        # parallel batch axis (v7x has two TensorCores).
        fit = max(1, rows_budget // R)
        tb = _largest_divisor_leq(B, min(fit, max(1, B // 2)))
        rows_per_sample = rows_budget // tb
        if R <= rows_per_sample:
            tr, nk = R, 1
        else:
            tr = max(SUBLANE, (rows_per_sample // SUBLANE) * SUBLANE)
            nk = pl.cdiv(R, tr)
        needs_mask = (nk * tr != R)

        grid = (B // tb, nk)
        in_spec = pl.BlockSpec((tb, tr, LANE), lambda b, k: (b, k, 0))
        out_spec = pl.BlockSpec((tb, 1, LANE), lambda b, k: (b, 0, 0))
        out_sds = jax.ShapeDtypeStruct((B, 1, LANE), jnp.float32)
        blk1, limit = tr, R
        args = (xk, tk)
    else:
        # ---- ragged path: consume the (B, N) view directly (zero-copy, no
        # jnp.pad); the <128-element tail appears only in the last reduction
        # block and is masked in-kernel.  Slight sublane under-fill when B < 8
        # is acceptable for this secondary path.
        # TODO(synk): for ragged small-B the parallel grid extent can be 1
        # (single v7x core); a reduction-chunk parallel split would fix it.
        tb = SUBLANE if B % SUBLANE == 0 else B
        padded_rows = _round_up(tb, SUBLANE)      # VMEM sublane padding if tb < 8
        tc = max(LANE, (block_budget_bytes // (padded_rows * itemsize)) // LANE * LANE)
        tc = min(tc, max(LANE, (N // LANE) * LANE))
        nk = pl.cdiv(N, tc)
        needs_mask = True

        grid = (B // tb, nk)
        in_spec = pl.BlockSpec((tb, tc), lambda b, k: (b, k))
        out_spec = pl.BlockSpec((tb, 1), lambda b, k: (b, 0))
        out_sds = jax.ShapeDtypeStruct((B, 1), jnp.float32)
        blk1, limit = tc, N
        args = (x, t)

    kernel = functools.partial(
        _dice_partial_kernel,
        sig=bool(sig), blk1=int(blk1), limit=int(limit),
        n_k=int(nk), needs_mask=bool(needs_mask))

    cost = pl.CostEstimate(
        flops=4 * B * N,
        transcendentals=(B * N) if sig else 0,
        bytes_accessed=B * N * (jnp.dtype(x.dtype).itemsize
                                + jnp.dtype(t.dtype).itemsize)
        + 8 * B * LANE)

    oi, osum = pl.pallas_call(
        kernel,
        out_shape=(out_sds, out_sds),
        grid=grid,
        in_specs=[in_spec, in_spec],
        out_specs=(out_spec, out_spec),
        compiler_params=pltpu.CompilerParams(
            dimension_semantics=("parallel", "arbitrary"),
            vmem_limit_bytes=_VMEM_LIMIT_BYTES),
        cost_estimate=cost,
    )(*args)

    # Finish in XLA: tiny (B, <=128) reduces + dice + batch mean.
    inter = jnp.sum(oi.reshape(B, -1), axis=-1)
    total = jnp.sum(osum.reshape(B, -1), axis=-1)
    dice = (2.0 * inter + smooth) / (total + smooth)
    return jnp.mean(1.0 - dice)


def _dice_loss_reference(inputs_, targets, smooth=1.0, sig=False):
    x = inputs_.reshape(inputs_.shape[0], -1).astype(jnp.float32)
    t = targets.reshape(targets.shape[0], -1).astype(jnp.float32)
    if sig:
        x = jax.nn.sigmoid(x)
    inter = jnp.sum(x * t, axis=1)
    dice = (2.0 * inter + smooth) / (jnp.sum(x, axis=1) + jnp.sum(t, axis=1) + smooth)
    return jnp.mean(1.0 - dice)


if __name__ == "__main__":
    key = jax.random.PRNGKey(0)
    k1, k2, k3, k4, k5, k6 = jax.random.split(key, 6)

    # --- small NCHW case (typical module usage), sig=False: aligned 3-D path ---
    B, C, H, W = 2, 4, 16, 16
    inputs_ = jax.random.uniform(k1, (B, C, H, W), dtype=jnp.float32)
    targets = (jax.random.uniform(k2, (B, C, H, W)) > 0.5).astype(jnp.float32)
    loss = jax.block_until_ready(dice_loss_batch(inputs_, targets, smooth=1.0, sig=False))
    ref = _dice_loss_reference(inputs_, targets, smooth=1.0, sig=False)
    assert jnp.allclose(loss, ref, atol=1e-5, rtol=1e-5), (loss, ref)

    # --- sig=True path (logits), exact tanh-form sigmoid ---
    logits = jax.random.normal(k3, (B, C, H, W), dtype=jnp.float32)
    loss_s = jax.block_until_ready(dice_loss_batch(logits, targets, smooth=1.0, sig=True))
    ref_s = _dice_loss_reference(logits, targets, smooth=1.0, sig=True)
    assert jnp.allclose(loss_s, ref_s, atol=1e-4, rtol=1e-4), (loss_s, ref_s)

    # --- multi-block reduction + last-step edge mask (small shapes, small budget) ---
    Bb, Cb, Hb, Wb = 2, 8, 96, 96          # N = 73728 -> R = 576 rows
    xb = jax.random.uniform(k4, (Bb, Cb, Hb, Wb), dtype=jnp.float32)
    tb_ = (jax.random.uniform(k5, (Bb, Cb, Hb, Wb)) > 0.5).astype(jnp.float32)
    loss_b = jax.block_until_ready(
        dice_loss_batch(xb, tb_, smooth=1.0, sig=False, block_budget_bytes=64 * 1024))
    ref_b = _dice_loss_reference(xb, tb_, smooth=1.0, sig=False)
    assert jnp.allclose(loss_b, ref_b, atol=1e-4, rtol=1e-4), (loss_b, ref_b)

    # --- ragged case (N % 128 != 0) with sigmoid: zero-copy 2-D path ---
    Br, Cr, Hr, Wr = 2, 3, 15, 17          # N = 765
    xr = jax.random.normal(k6, (Br, Cr, Hr, Wr), dtype=jnp.float32)
    tr_ = (jax.random.uniform(k2, (Br, Cr, Hr, Wr)) > 0.5).astype(jnp.float32)
    loss_r = jax.block_until_ready(dice_loss_batch(xr, tr_, smooth=1.0, sig=True))
    ref_r = _dice_loss_reference(xr, tr_, smooth=1.0, sig=True)
    assert jnp.allclose(loss_r, ref_r, atol=1e-4, rtol=1e-4), (loss_r, ref_r)

    print("KERNEL_OK")
</pallas_src>

<mosaic_0001>
module attributes {stable_mosaic.version = 11 : i64} {
  func.func @_dice_partial_kernel(%arg0: i32, %arg1: i32, %arg2: memref<1x8x128xf32, #tpu.memory_space<vmem>>, %arg3: memref<1x8x128xf32, #tpu.memory_space<vmem>>, %arg4: memref<1x1x128xf32, #tpu.memory_space<vmem>>, %arg5: memref<1x1x128xf32, #tpu.memory_space<vmem>>) attributes {dimension_semantics = [#tpu.dimension_semantics<parallel>, #tpu.dimension_semantics<arbitrary>], iteration_bounds = array<i64: 2, 1>, scalar_prefetch = 0 : i64, scratch_operands = 0 : i64, tpu.core_type = #tpu.core_type<tc>, window_params = [{transform_indices = @transform_0, window_bounds = array<i64: 1, 8, 128>}, {transform_indices = @transform_1, window_bounds = array<i64: 1, 8, 128>}, {transform_indices = @transform_2, window_bounds = array<i64: 1, 1, 128>}, {transform_indices = @transform_3, window_bounds = array<i64: 1, 1, 128>}]} {
    %c0_i32 = arith.constant 0 : i32
    %0 = arith.cmpi eq, %arg1, %c0_i32 : i32
    %1 = arith.extui %0 : i1 to i32
    %c0_i32_0 = arith.constant 0 : i32
    %2 = arith.cmpi ne, %1, %c0_i32_0 : i32
    scf.if %2 {
      %cst_19 = arith.constant 0.000000e+00 : f32
      %17 = vector.broadcast %cst_19 : f32 to vector<1x1x128xf32>
      %c0_20 = arith.constant 0 : index
      %c0_21 = arith.constant 0 : index
      %c0_22 = arith.constant 0 : index
      %18 = vector.load %arg4[%c0_20, %c0_21, %c0_22] : memref<1x1x128xf32, #tpu.memory_space<vmem>>, vector<1x1x128xf32>
      tpu.vector_store %arg4[%c0_20, %c0_21, %c0_22], %17 {strides = array<i32>} : memref<1x1x128xf32, #tpu.memory_space<vmem>>, vector<1x1x128xf32>,
      %cst_23 = arith.constant 0.000000e+00 : f32
      %19 = vector.broadcast %cst_23 : f32 to vector<1x1x128xf32>
      %c0_24 = arith.constant 0 : index
      %c0_25 = arith.constant 0 : index
      %c0_26 = arith.constant 0 : index
      %20 = vector.load %arg5[%c0_24, %c0_25, %c0_26] : memref<1x1x128xf32, #tpu.memory_space<vmem>>, vector<1x1x128xf32>
      tpu.vector_store %arg5[%c0_24, %c0_25, %c0_26], %19 {strides = array<i32>} : memref<1x1x128xf32, #tpu.memory_space<vmem>>, vector<1x1x128xf32>,
    } else {
    }
    %c0 = arith.constant 0 : index
    %c0_1 = arith.constant 0 : index
    %c0_2 = arith.constant 0 : index
    %3 = vector.load %arg2[%c0, %c0_1, %c0_2] : memref<1x8x128xf32, #tpu.memory_space<vmem>>, vector<1x8x128xf32>
    %c0_3 = arith.constant 0 : index
    %c0_4 = arith.constant 0 : index
    %c0_5 = arith.constant 0 : index
    %4 = vector.load %arg3[%c0_3, %c0_4, %c0_5] : memref<1x8x128xf32, #tpu.memory_space<vmem>>, vector<1x8x128xf32>
    %c0_6 = arith.constant 0 : index
    %c0_7 = arith.constant 0 : index
    %c0_8 = arith.constant 0 : index
    %5 = vector.load %arg4[%c0_6, %c0_7, %c0_8] : memref<1x1x128xf32, #tpu.memory_space<vmem>>, vector<1x1x128xf32>
    %6 = arith.mulf %3, %4 : vector<1x8x128xf32>
    %cst = arith.constant dense<0.000000e+00> : vector<1x128xf32>
    %7 = vector.multi_reduction <add>, %6, %cst [1] : vector<1x8x128xf32> to vector<1x128xf32>
    %8 = vector.shape_cast %7 : vector<1x128xf32> to vector<1x1x128xf32>
    %9 = arith.addf %5, %8 : vector<1x1x128xf32>
    %c0_9 = arith.constant 0 : index
    %c0_10 = arith.constant 0 : index
    %c0_11 = arith.constant 0 : index
    %10 = vector.load %arg4[%c0_9, %c0_10, %c0_11] : memref<1x1x128xf32, #tpu.memory_space<vmem>>, vector<1x1x128xf32>
    tpu.vector_store %arg4[%c0_9, %c0_10, %c0_11], %9 {strides = array<i32>} : memref<1x1x128xf32, #tpu.memory_space<vmem>>, vector<1x1x128xf32>,
    %c0_12 = arith.constant 0 : index
    %c0_13 = arith.constant 0 : index
    %c0_14 = arith.constant 0 : index
    %11 = vector.load %arg5[%c0_12, %c0_13, %c0_14] : memref<1x1x128xf32, #tpu.memory_space<vmem>>, vector<1x1x128xf32>
    %12 = arith.addf %3, %4 : vector<1x8x128xf32>
    %cst_15 = arith.constant dense<0.000000e+00> : vector<1x128xf32>
    %13 = vector.multi_reduction <add>, %12, %cst_15 [1] : vector<1x8x128xf32> to vector<1x128xf32>
    %14 = vector.shape_cast %13 : vector<1x128xf32> to vector<1x1x128xf32>
    %15 = arith.addf %11, %14 : vector<1x1x128xf32>
    %c0_16 = arith.constant 0 : index
    %c0_17 = arith.constant 0 : index
    %c0_18 = arith.constant 0 : index
    %16 = vector.load %arg5[%c0_16, %c0_17, %c0_18] : memref<1x1x128xf32, #tpu.memory_space<vmem>>, vector<1x1x128xf32>
    tpu.vector_store %arg5[%c0_16, %c0_17, %c0_18], %15 {strides = array<i32>} : memref<1x1x128xf32, #tpu.memory_space<vmem>>, vector<1x1x128xf32>,
    return
  }
  func.func @transform_0(%arg0: i32, %arg1: i32) -> (i32, i32, i32) {
    %c0_i32 = arith.constant 0 : i32
    %c0_i32_0 = arith.constant 0 : i32
    return %arg0, %arg1, %c0_i32 : i32, i32, i32
  }
  func.func @transform_1(%arg0: i32, %arg1: i32) -> (i32, i32, i32) {
    %c0_i32 = arith.constant 0 : i32
    %c0_i32_0 = arith.constant 0 : i32
    return %arg0, %arg1, %c0_i32 : i32, i32, i32
  }
  func.func @transform_2(%arg0: i32, %arg1: i32) -> (i32, i32, i32) {
    %c0_i32 = arith.constant 0 : i32
    %c0_i32_0 = arith.constant 0 : i32
    %c0_i32_1 = arith.constant 0 : i32
    return %arg0, %c0_i32, %c0_i32_0 : i32, i32, i32
  }
  func.func @transform_3(%arg0: i32, %arg1: i32) -> (i32, i32, i32) {
    %c0_i32 = arith.constant 0 : i32
    %c0_i32_0 = arith.constant 0 : i32
    %c0_i32_1 = arith.constant 0 : i32
    return %arg0, %c0_i32, %c0_i32_0 : i32, i32, i32
  }
}

</mosaic_0001>

<bundles_post_ra>
// kernel: dice_loss_batch.1
= control target key start
LH: loop header
LB: loop body
LE: loop exit
PB: predicated region body
PF: predicated region fallthrough
CT: control target
= control target key end

     0   :  { %s429_s12 = smov 0   ;;  %s431_s13 = smov 0   ;;  %s468_s0 = inlined_call_operand.vmem [shape: f32[2,8,128], index: 0, kind: input, shape index: {}]   ;;  %s469_s1 = inlined_call_operand.vmem [shape: f32[2,8,128], index: 1, kind: input, shape index: {}]   ;;  %s470_s2 = inlined_call_operand.vmem [shape: f32[2,1,128], index: 2, kind: output, shape index: {0}]   ;;  %s471_s3 = inlined_call_operand.vmem [shape: f32[2,1,128], index: 3, kind: output, shape index: {1}]  }
   0x1   :  { %s433_s14 = smov 0  }
   0x2 LB: > { %s26_s15 = sadd.s32 1, %s402_s13  ;;  %p354_p0 = scmp.ge.s32.totalorder %s406_s14, 1  ;;  %s406_s14 = sphi %s433_s14, %s14_s14   ;;  %s402_s13 = sphi %s431_s13, %s473_s13   ;;  %s398_s12 = sphi %s429_s12, %s472_s12  }
   0x3   : > { %p28_p1 = scmp.ge.s32.totalorder %s26_s15, 2  ;;  %p170_p2 = scmp.lt.s32.totalorder %s406_s14, 3 }
   0x5   : > { %s475_s15 = smov (%p28_p1, %s26_s15), 0  ;;  %p171_p3 = pnand %p354_p0, %p170_p2 }
   0x6   : > { %p204_p4 = scmp.lt.s32.totalorder (!%p171_p3), %s398_s12, 1 }
   0x7   : > { %174 = sbr.rel (%p171_p3) target bundleno = 34 (0x22), region = 28 }
   0xc   : > { %s477_s12 = smov (!%p204_p4, %s398_s12), 1  ;;  %v408_v0 = vmov 0.0  }
   0xd   : > { %s355_s16 = sshll.u32 %s477_s12, 3  ;;  %s220_s19 = scalar_lea.vmem %s470_s2, %s477_s12 }
   0xe   : > { %s210_s22 = scalar_lea.vmem %s468_s0, %s355_s16  ;;  %s217_s25 = scalar_lea.vmem %s469_s1, %s355_s16  ;;  %228 = vst [vmem:[%s220_s19] sm:$0x1] %v408_v0 }
   0xf   : > { %v230_v1 = vld [vmem:[%s210_s22] sm:$0xff]  ;;  %s223_s28 = scalar_lea.vmem %s471_s3, %s477_s12 }
  0x10   : > { %v231_v2 = vld [vmem:[%s217_s25] sm:$0xff]  ;;  %229 = vst [vmem:[%s223_s28] sm:$0x1] %v408_v0 }
  0x11   : > { %v233_v3 = vmul.f32 %v231_v2, %v230_v1  ;;  %v243_v4 = vadd.f32 %v231_v2, %v230_v1 }
  0x13   : > { %v234_v5 = vrot.slane %v233_v3, 4  ;;  %v244_v6 = vrot.slane %v243_v4, 4 }
  0x15   : > { %v235_v7 = vadd.f32 %v234_v5, %v233_v3  ;;  %v245_v8 = vadd.f32 %v244_v6, %v243_v4  ;;  %v232_v15 = vld [vmem:[%s220_s19] sm:$0x1] }
  0x17   : > { %v236_v9 = vrot.slane %v235_v7, 2  ;;  %v246_v10 = vrot.slane %v245_v8, 2  ;;  %v242_v16 = vld [vmem:[%s223_s28] sm:$0x1] }
  0x19   : > { %v237_v11 = vadd.f32 %v236_v9, %v235_v7  ;;  %v247_v12 = vadd.f32 %v246_v10, %v245_v8 }
  0x1b   : > { %v238_v13 = vrot.slane %v237_v11, 1  ;;  %v248_v14 = vrot.slane %v247_v12, 1 }
  0x1d   : > { %v239_v17 = vadd.f32 %v238_v13, %v237_v11  ;;  %v249_v18 = vadd.f32 %v248_v14, %v247_v12 }
  0x1f   : > { %v240_v19 = vadd.f32 %v239_v17, %v232_v15  ;;  %v250_v20 = vadd.f32 %v249_v18, %v242_v16 }
  0x21   : > { %241 = vst [vmem:[%s220_s19] sm:$0x1] %v240_v19  ;;  %251 = vst [vmem:[%s223_s28] sm:$0x1] %v250_v20 }
  0x22 PF: > { %s14_s14 = sadd.s32 1, %s406_s14   ;;  %s472_s12 = smov %s402_s13 }
  0x23   : > { %p11_p5 = scmp.ge.s32.totalorder %s14_s14, 4   ;;  %s473_s13 = smov %s475_s15 }
  0x25   :  { %13 = sbr.rel (!%p11_p5) target bundleno = 2 (0x2), region = 77 }

</bundles_post_ra>
